<compile_context>
chip_gen: v6e
topology: v6e:2x2x1
jax: 0.10.0
libtpu: 0.0.40
codegen_flags: <defaults>
</compile_context>

<pallas_src>
import functools

import jax
import jax.numpy as jnp
from jax.experimental import pallas as pl
from jax.experimental.pallas import tpu as pltpu


# ---------------------------------------------------------------------------
# Pallas kernel: one batch-block (BB batch elements) per grid step.
# ---------------------------------------------------------------------------
def spatial_gcn_kernel(x_ref,       # (BB, P, N)   channels-first tokens
                       consts_ref,  # (3C, P+C+2)  packed [Wkvq | bkvq | W_eff | b_eff]
                       o_ref,       # (BB, P, N)
                       *, P, C, BB):
    C3 = 3 * C
    N = x_ref.shape[2]

    # Unpack the single packed constant block (static slices, all tiny).
    wkvq = consts_ref[:, 0:P]                        # (3C, P)
    bkvq = consts_ref[:, P:P + 1]                    # (3C, 1)
    w_eff = consts_ref[0:P, P + 1:P + 1 + C]         # (P, C)
    b_eff = consts_ref[0:P, P + 1 + C:P + 2 + C]     # (P, 1)

    # Hoist the per-channel -> lane broadcasts once (JAX does not CSE them).
    bkvq_b = jnp.broadcast_to(bkvq, (C3, N))         # (3C, N)
    beff_b = jnp.broadcast_to(b_eff, (P, N))         # (P, N)

    # Static unroll over the (tiny) per-step batch block.
    for b in range(BB):
        x_b = x_ref[b]                               # (P, N), N lane-dense

        # Fused node_k / node_v / node_q: one (3C, P) @ (P, N) matmul + bias.
        kvq = jnp.dot(wkvq, x_b,
                      preferred_element_type=jnp.float32) + bkvq_b   # (3C, N)
        k = kvq[0:C]                                 # (C, N)
        v = kvq[C:2 * C]                             # (C, N)
        q = kvq[2 * C:3 * C]                         # (C, N)

        # Attention matrix A = q @ v^T  (contract over tokens N) -> (C, C).
        a = jax.lax.dot_general(q, v, (((1,), (1,)), ((), ())),
                                preferred_element_type=jnp.float32)

        # softmax over the last axis (torch dim=2); exact division to stay
        # well inside the 1e-4 tolerance.
        a = a - jnp.max(a, axis=-1, keepdims=True)
        e = jnp.exp(a)
        a = e / jnp.sum(e, axis=-1, keepdims=True)

        # Channels-first AV = A^T @ k  -> (C, N)   (== torch (node_k @ A)^T).
        av = jax.lax.dot_general(a, k, (((0,), (0,)), ((), ())),
                                 preferred_element_type=jnp.float32)

        # Folded conv_wg + bn_wg + out-conv + bn_out, then residual + ReLU.
        out = jnp.dot(w_eff, av,
                      preferred_element_type=jnp.float32) + beff_b   # (P, N)
        o_ref[b] = jnp.maximum(out + x_b, 0.0).astype(o_ref.dtype)


# ---------------------------------------------------------------------------
# Wrapper: layout glue, BN / tail folding, constant packing, pallas_call.
# ---------------------------------------------------------------------------
def _num_batch_blocks(B):
    """2 parallel batch blocks on 2-TC chips (v7x), 1 block otherwise."""
    try:
        kind = jax.devices()[0].device_kind.lower()
    except Exception:
        kind = ""
    two_core = ("v7" in kind) or ("7x" in kind)
    if two_core and B >= 2 and B % 2 == 0:
        return 2
    return 1


def spatial_gcn(x_nchw, params, eps=1e-5):
    B, P, H, W = x_nchw.shape
    C = P // 2
    N = H * W

    # NCHW -> (B, P, N) is a pure reshape (no HBM transpose pass).
    x = x_nchw.reshape(B, P, N).astype(jnp.float32)

    # ---- fuse the three 1x1 convs into one weight / bias -------------------
    wkvq = jnp.concatenate([params["wk"], params["wv"], params["wq"]], axis=0)  # (3C, P)
    bkvq = jnp.concatenate([params["bk"], params["bv"], params["bq"]], axis=0)  # (3C,)

    # ---- fold conv_wg + BN1d + out-conv + BN2d into (W_eff, b_eff) ---------
    g_scale = params["g_gamma"] / jnp.sqrt(params["g_var"] + eps)     # (C,)
    g_shift = params["g_beta"] - params["g_mean"] * g_scale           # (C,)
    o_scale = params["o_gamma"] / jnp.sqrt(params["o_var"] + eps)     # (P,)
    o_shift = params["o_beta"] - params["o_mean"] * o_scale           # (P,)

    w_eff = (o_scale[:, None] * params["wo"]) @ (g_scale[:, None] * params["wg"])   # (P, C)
    b_eff = o_scale * (params["wo"] @ g_shift + params["bo"]) + o_shift              # (P,)

    # ---- pack all constants into a single operand --------------------------
    CW = P + 1 + C + 1
    consts = jnp.zeros((3 * C, CW), jnp.float32)
    consts = consts.at[:, 0:P].set(wkvq)
    consts = consts.at[:, P].set(bkvq)
    consts = consts.at[0:P, P + 1:P + 1 + C].set(w_eff)
    consts = consts.at[0:P, P + 1 + C].set(b_eff)

    # ---- grid: 1 step (v5e/v6e) or 2 parallel batch blocks (v7x) -----------
    num_blocks = _num_batch_blocks(B)
    BB = B // num_blocks

    out = pl.pallas_call(
        functools.partial(spatial_gcn_kernel, P=P, C=C, BB=BB),
        out_shape=jax.ShapeDtypeStruct((B, P, N), jnp.float32),
        grid_spec=pltpu.PrefetchScalarGridSpec(
            num_scalar_prefetch=0,
            grid=(num_blocks,),
            in_specs=[
                pl.BlockSpec((BB, P, N), lambda i: (i, 0, 0)),      # x
                pl.BlockSpec((3 * C, CW), lambda i: (0, 0)),        # packed consts
            ],
            out_specs=pl.BlockSpec((BB, P, N), lambda i: (i, 0, 0)),
        ),
        compiler_params=pltpu.CompilerParams(
            dimension_semantics=("parallel",)),
    )(x, consts)

    # (B, P, N) -> NCHW is again a pure reshape.
    return out.reshape(B, P, H, W)


# ---------------------------------------------------------------------------
# Pure-JAX reference (mirrors the PyTorch forward exactly, NCHW).
# ---------------------------------------------------------------------------
def spatial_gcn_reference(x, params, eps=1e-5):
    B, P, H, W = x.shape
    C = P // 2
    N = H * W

    def conv1x1(z, w, bias):
        y = jnp.einsum("bihw,oi->bohw", z, w)
        return y + bias[None, :, None, None]

    nk = conv1x1(x, params["wk"], params["bk"]).reshape(B, C, N).transpose(0, 2, 1)
    nv = conv1x1(x, params["wv"], params["bv"]).reshape(B, C, N).transpose(0, 2, 1)
    nq = conv1x1(x, params["wq"], params["bq"]).reshape(B, C, N)

    av = jnp.einsum("bcn,bnd->bcd", nq, nv)
    av = jax.nn.softmax(av, axis=2)
    av = jnp.einsum("bnc,bcd->bnd", nk, av)
    av = av.transpose(0, 2, 1)                                   # (B, C, N)

    avw = jnp.einsum("oc,bcn->bon", params["wg"], av)
    g_scale = params["g_gamma"] / jnp.sqrt(params["g_var"] + eps)
    g_shift = params["g_beta"] - params["g_mean"] * g_scale
    avw = avw * g_scale[None, :, None] + g_shift[None, :, None]
    avw = avw.reshape(B, C, H, W)

    out = conv1x1(avw, params["wo"], params["bo"])
    o_scale = params["o_gamma"] / jnp.sqrt(params["o_var"] + eps)
    o_shift = params["o_beta"] - params["o_mean"] * o_scale
    out = out * o_scale[None, :, None, None] + o_shift[None, :, None, None]
    return jax.nn.relu(out + x)


# ---------------------------------------------------------------------------
if __name__ == "__main__":
    B, P, H, W = 2, 8, 16, 16           # plane = 8 -> inter_plane = 4
    C = P // 2

    key = jax.random.PRNGKey(0)
    ks = jax.random.split(key, 16)
    normal = lambda k, s, sc=0.1: sc * jax.random.normal(k, s, jnp.float32)

    params = {
        # 1x1 Conv2d weights (out, in) + bias
        "wk": normal(ks[0], (C, P)), "bk": normal(ks[1], (C,)),
        "wv": normal(ks[2], (C, P)), "bv": normal(ks[3], (C,)),
        "wq": normal(ks[4], (C, P)), "bq": normal(ks[5], (C,)),
        # Conv1d k=1, no bias
        "wg": normal(ks[6], (C, C)),
        # BatchNorm1d (inference-mode running stats)
        "g_gamma": 1.0 + normal(ks[7], (C,)),
        "g_beta": normal(ks[8], (C,)),
        "g_mean": normal(ks[9], (C,)),
        "g_var": jnp.abs(normal(ks[10], (C,))) + 0.5,
        # out: Conv2d (plane, inter_plane) + BatchNorm2d
        "wo": normal(ks[11], (P, C)), "bo": normal(ks[12], (P,)),
        "o_gamma": 1.0 + normal(ks[13], (P,)),
        "o_beta": normal(ks[14], (P,)),
        "o_mean": jnp.zeros((P,), jnp.float32),
        "o_var": jnp.ones((P,), jnp.float32),
    }

    x = jax.random.normal(ks[15], (B, P, H, W), jnp.float32)

    y_kernel = jax.block_until_ready(spatial_gcn(x, params))
    y_ref = jax.block_until_ready(spatial_gcn_reference(x, params))

    assert y_kernel.shape == (B, P, H, W)
    assert jnp.allclose(y_kernel, y_ref, rtol=1e-4, atol=1e-4), (
        float(jnp.max(jnp.abs(y_kernel - y_ref))))

    print("KERNEL_OK")
</pallas_src>

<mosaic_0001>
module attributes {stable_mosaic.version = 11 : i64} {
  func.func @spatial_gcn_kernel(%arg0: i32, %arg1: memref<2x8x256xf32, #tpu.memory_space<vmem>>, %arg2: memref<12x14xf32, #tpu.memory_space<vmem>>, %arg3: memref<2x8x256xf32, #tpu.memory_space<vmem>>) attributes {dimension_semantics = [#tpu.dimension_semantics<parallel>], iteration_bounds = array<i64: 1>, scalar_prefetch = 0 : i64, scratch_operands = 0 : i64, tpu.core_type = #tpu.core_type<tc>, window_params = [{transform_indices = @transform_0, window_bounds = array<i64: 2, 8, 256>}, {pipeline_mode = #tpu.pipeline_mode<synchronous>, transform_indices = @transform_1, window_bounds = array<i64: 12, 14>}, {transform_indices = @transform_2, window_bounds = array<i64: 2, 8, 256>}]} {
    %c0 = arith.constant 0 : index
    %c0_0 = arith.constant 0 : index
    %0 = vector.load %arg2[%c0, %c0_0] : memref<12x14xf32, #tpu.memory_space<vmem>>, vector<12x8xf32>
    %c0_1 = arith.constant 0 : index
    %c8 = arith.constant 8 : index
    %1 = vector.load %arg2[%c0_1, %c8] : memref<12x14xf32, #tpu.memory_space<vmem>>, vector<12x1xf32>
    %c0_2 = arith.constant 0 : index
    %c9 = arith.constant 9 : index
    %2 = vector.load %arg2[%c0_2, %c9] : memref<12x14xf32, #tpu.memory_space<vmem>>, vector<8x4xf32>
    %c0_3 = arith.constant 0 : index
    %c13 = arith.constant 13 : index
    %3 = vector.load %arg2[%c0_3, %c13] : memref<12x14xf32, #tpu.memory_space<vmem>>, vector<8x1xf32>
    %4 = vector.shape_cast %1 : vector<12x1xf32> to vector<12x1xf32>
    %5 = vector.broadcast %4 : vector<12x1xf32> to vector<12x256xf32>
    %6 = vector.shape_cast %3 : vector<8x1xf32> to vector<8x1xf32>
    %7 = vector.broadcast %6 : vector<8x1xf32> to vector<8x256xf32>
    %c0_4 = arith.constant 0 : index
    %c0_5 = arith.constant 0 : index
    %c0_6 = arith.constant 0 : index
    %8 = vector.load %arg1[%c0_4, %c0_5, %c0_6] : memref<2x8x256xf32, #tpu.memory_space<vmem>>, vector<1x8x256xf32>
    %9 = vector.shape_cast %8 : vector<1x8x256xf32> to vector<8x256xf32>
    %cst = arith.constant dense<0.000000e+00> : vector<12x256xf32>
    %10 = tpu.matmul %0, %9, %cst {dimension_numbers = #tpu.dot_dimension_numbers<[1], [0], [0], [1], [0, 0, 1, 1], [], []>} : vector<12x8xf32>, vector<8x256xf32>, vector<12x256xf32> -> vector<12x256xf32>
    %11 = arith.addf %10, %5 : vector<12x256xf32>
    %12 = vector.extract_strided_slice %11 {offsets = [0, 0], sizes = [4, 256], strides = [1, 1]} : vector<12x256xf32> to vector<4x256xf32>
    %13 = vector.extract_strided_slice %11 {offsets = [4, 0], sizes = [4, 256], strides = [1, 1]} : vector<12x256xf32> to vector<4x256xf32>
    %14 = vector.extract_strided_slice %11 {offsets = [8, 0], sizes = [4, 256], strides = [1, 1]} : vector<12x256xf32> to vector<4x256xf32>
    %cst_7 = arith.constant dense<0.000000e+00> : vector<4x4xf32>
    %15 = tpu.matmul %14, %13, %cst_7 {dimension_numbers = #tpu.dot_dimension_numbers<[1], [1], [0], [0], [0, 0, 1, 0], [], []>} : vector<4x256xf32>, vector<4x256xf32>, vector<4x4xf32> -> vector<4x4xf32>
    %cst_8 = arith.constant dense<0xFF800000> : vector<4xf32>
    %16 = vector.multi_reduction <maximumf>, %15, %cst_8 [1] : vector<4x4xf32> to vector<4xf32>
    %17 = vector.shape_cast %16 : vector<4xf32> to vector<4x1xf32>
    %18 = vector.broadcast %17 : vector<4x1xf32> to vector<4x4xf32>
    %19 = arith.subf %15, %18 : vector<4x4xf32>
    %20 = math.exp %19 : vector<4x4xf32>
    %cst_9 = arith.constant dense<0.000000e+00> : vector<4xf32>
    %21 = vector.multi_reduction <add>, %20, %cst_9 [1] : vector<4x4xf32> to vector<4xf32>
    %22 = vector.shape_cast %21 : vector<4xf32> to vector<4x1xf32>
    %23 = vector.broadcast %22 : vector<4x1xf32> to vector<4x4xf32>
    %24 = arith.divf %20, %23 : vector<4x4xf32>
    %cst_10 = arith.constant dense<0.000000e+00> : vector<4x256xf32>
    %25 = tpu.matmul %24, %12, %cst_10 {dimension_numbers = #tpu.dot_dimension_numbers<[0], [0], [1], [1], [0, 1, 1, 1], [], []>} : vector<4x4xf32>, vector<4x256xf32>, vector<4x256xf32> -> vector<4x256xf32>
    %cst_11 = arith.constant dense<0.000000e+00> : vector<8x256xf32>
    %26 = tpu.matmul %2, %25, %cst_11 {dimension_numbers = #tpu.dot_dimension_numbers<[1], [0], [0], [1], [0, 0, 1, 1], [], []>} : vector<8x4xf32>, vector<4x256xf32>, vector<8x256xf32> -> vector<8x256xf32>
    %27 = arith.addf %26, %7 : vector<8x256xf32>
    %28 = arith.addf %27, %9 : vector<8x256xf32>
    %cst_12 = arith.constant 0.000000e+00 : f32
    %29 = vector.broadcast %cst_12 : f32 to vector<8x256xf32>
    %30 = arith.maximumf %28, %29 : vector<8x256xf32>
    %c0_13 = arith.constant 0 : index
    %c0_14 = arith.constant 0 : index
    %c0_15 = arith.constant 0 : index
    %31 = vector.load %arg3[%c0_13, %c0_14, %c0_15] : memref<2x8x256xf32, #tpu.memory_space<vmem>>, vector<1x8x256xf32>
    %32 = vector.shape_cast %31 : vector<1x8x256xf32> to vector<8x256xf32>
    %33 = vector.shape_cast %30 : vector<8x256xf32> to vector<1x8x256xf32>
    tpu.vector_store %arg3[%c0_13, %c0_14, %c0_15], %33 {strides = array<i32>} : memref<2x8x256xf32, #tpu.memory_space<vmem>>, vector<1x8x256xf32>,
    %c1 = arith.constant 1 : index
    %c0_16 = arith.constant 0 : index
    %c0_17 = arith.constant 0 : index
    %34 = vector.load %arg1[%c1, %c0_16, %c0_17] : memref<2x8x256xf32, #tpu.memory_space<vmem>>, vector<1x8x256xf32>
    %35 = vector.shape_cast %34 : vector<1x8x256xf32> to vector<8x256xf32>
    %cst_18 = arith.constant dense<0.000000e+00> : vector<12x256xf32>
    %36 = tpu.matmul %0, %35, %cst_18 {dimension_numbers = #tpu.dot_dimension_numbers<[1], [0], [0], [1], [0, 0, 1, 1], [], []>} : vector<12x8xf32>, vector<8x256xf32>, vector<12x256xf32> -> vector<12x256xf32>
    %37 = arith.addf %36, %5 : vector<12x256xf32>
    %38 = vector.extract_strided_slice %37 {offsets = [0, 0], sizes = [4, 256], strides = [1, 1]} : vector<12x256xf32> to vector<4x256xf32>
    %39 = vector.extract_strided_slice %37 {offsets = [4, 0], sizes = [4, 256], strides = [1, 1]} : vector<12x256xf32> to vector<4x256xf32>
    %40 = vector.extract_strided_slice %37 {offsets = [8, 0], sizes = [4, 256], strides = [1, 1]} : vector<12x256xf32> to vector<4x256xf32>
    %cst_19 = arith.constant dense<0.000000e+00> : vector<4x4xf32>
    %41 = tpu.matmul %40, %39, %cst_19 {dimension_numbers = #tpu.dot_dimension_numbers<[1], [1], [0], [0], [0, 0, 1, 0], [], []>} : vector<4x256xf32>, vector<4x256xf32>, vector<4x4xf32> -> vector<4x4xf32>
    %cst_20 = arith.constant dense<0xFF800000> : vector<4xf32>
    %42 = vector.multi_reduction <maximumf>, %41, %cst_20 [1] : vector<4x4xf32> to vector<4xf32>
    %43 = vector.shape_cast %42 : vector<4xf32> to vector<4x1xf32>
    %44 = vector.broadcast %43 : vector<4x1xf32> to vector<4x4xf32>
    %45 = arith.subf %41, %44 : vector<4x4xf32>
    %46 = math.exp %45 : vector<4x4xf32>
    %cst_21 = arith.constant dense<0.000000e+00> : vector<4xf32>
    %47 = vector.multi_reduction <add>, %46, %cst_21 [1] : vector<4x4xf32> to vector<4xf32>
    %48 = vector.shape_cast %47 : vector<4xf32> to vector<4x1xf32>
    %49 = vector.broadcast %48 : vector<4x1xf32> to vector<4x4xf32>
    %50 = arith.divf %46, %49 : vector<4x4xf32>
    %cst_22 = arith.constant dense<0.000000e+00> : vector<4x256xf32>
    %51 = tpu.matmul %50, %38, %cst_22 {dimension_numbers = #tpu.dot_dimension_numbers<[0], [0], [1], [1], [0, 1, 1, 1], [], []>} : vector<4x4xf32>, vector<4x256xf32>, vector<4x256xf32> -> vector<4x256xf32>
    %cst_23 = arith.constant dense<0.000000e+00> : vector<8x256xf32>
    %52 = tpu.matmul %2, %51, %cst_23 {dimension_numbers = #tpu.dot_dimension_numbers<[1], [0], [0], [1], [0, 0, 1, 1], [], []>} : vector<8x4xf32>, vector<4x256xf32>, vector<8x256xf32> -> vector<8x256xf32>
    %53 = arith.addf %52, %7 : vector<8x256xf32>
    %54 = arith.addf %53, %35 : vector<8x256xf32>
    %cst_24 = arith.constant 0.000000e+00 : f32
    %55 = vector.broadcast %cst_24 : f32 to vector<8x256xf32>
    %56 = arith.maximumf %54, %55 : vector<8x256xf32>
    %c1_25 = arith.constant 1 : index
    %c0_26 = arith.constant 0 : index
    %c0_27 = arith.constant 0 : index
    %57 = vector.load %arg3[%c1_25, %c0_26, %c0_27] : memref<2x8x256xf32, #tpu.memory_space<vmem>>, vector<1x8x256xf32>
    %58 = vector.shape_cast %57 : vector<1x8x256xf32> to vector<8x256xf32>
    %59 = vector.shape_cast %56 : vector<8x256xf32> to vector<1x8x256xf32>
    tpu.vector_store %arg3[%c1_25, %c0_26, %c0_27], %59 {strides = array<i32>} : memref<2x8x256xf32, #tpu.memory_space<vmem>>, vector<1x8x256xf32>,
    return
  }
  func.func @transform_0(%arg0: i32) -> (i32, i32, i32) {
    %c0_i32 = arith.constant 0 : i32
    %c0_i32_0 = arith.constant 0 : i32
    %c0_i32_1 = arith.constant 0 : i32
    return %arg0, %c0_i32, %c0_i32_0 : i32, i32, i32
  }
  func.func @transform_1(%arg0: i32) -> (i32, i32) {
    %c0_i32 = arith.constant 0 : i32
    %c0_i32_0 = arith.constant 0 : i32
    %c0_i32_1 = arith.constant 0 : i32
    return %c0_i32, %c0_i32_0 : i32, i32
  }
  func.func @transform_2(%arg0: i32) -> (i32, i32, i32) {
    %c0_i32 = arith.constant 0 : i32
    %c0_i32_0 = arith.constant 0 : i32
    %c0_i32_1 = arith.constant 0 : i32
    return %arg0, %c0_i32, %c0_i32_0 : i32, i32, i32
  }
}

</mosaic_0001>

<bundles_post_ra>
// kernel: tpu_custom_call.1
= control target key start
LH: loop header
LB: loop body
LE: loop exit
PB: predicated region body
PF: predicated region fallthrough
CT: control target
= control target key end

     0   :  { %7 = vsyncpa [#allocation3], 0  ;;  %s1001_s0 = inlined_call_operand.hbm [shape: f32[2,8,256], index: 0, kind: input, shape index: {}]   ;;  %s1002_s1 = inlined_call_operand.hbm [shape: f32[12,14], index: 1, kind: input, shape index: {}]   ;;  %s1003_s2 = inlined_call_operand.hbm [shape: f32[2,8,256], index: 2, kind: output, shape index: {}]  }
   0x1   :  { %8 = vsyncpa [#allocation6], 0 }
   0x2   :  { %9 = vsyncpa [#allocation4], 0  ;;  %s909_s9 = smov [#allocation2]  }
   0x3   :  { %s15_s10 = sshll.u32 %s909_s9, 4  ;;  %s16_s10 = int_to_ptr.vmem [resolvable:$true] %s15_s10 }
   0x4   :  { %s851_s11 = scalar_lea.vmem %s16_s10, 512  ;;  %p856_p1 = scmp.lt.s32.totalorder %s16_s10, %s16_s10 }
   0x5   :  { %p852_p0 = scmp.ne.s32.totalorder %s16_s10, %s851_s11  ;;  %p857_p2 = scmp.lt.s32.totalorder %s851_s11, %s851_s11 }
   0x7   :  { %p858_p3 = por %p857_p2, %p856_p1 }
   0x9   :  { %p859_p4 = pnand %p858_p3, %p852_p0 }
   0xb   :  { %862 = shalt.err (!%p859_p4)
}
   0xc   :  { %s910_s12 = smov 256   ;;  %s911_s13 = smov 16  }
   0xd   :  { %21 = dma.hbm_to_vmem [thread:$0]  %s1001_s0, 512, %s16_s10, [#allocation3], %s910_s12, %s910_s12, %s911_s13  }
   0xe   :  { %s912_s16 = smov [#allocation5]  }
   0xf   :  { %s27_s17 = sshll.u32 %s912_s16, 4  ;;  %s28_s17 = int_to_ptr.vmem [resolvable:$true] %s27_s17 }
  0x10   :  { %s871_s18 = scalar_lea.vmem %s28_s17, 256  ;;  %p876_p6 = scmp.lt.s32.totalorder %s28_s17, %s28_s17 }
  0x11   :  { %p872_p5 = scmp.ne.s32.totalorder %s28_s17, %s871_s18  ;;  %p877_p7 = scmp.lt.s32.totalorder %s871_s18, %s871_s18 }
  0x13   :  { %p878_p8 = por %p877_p7, %p876_p6 }
  0x15   :  { %p879_p9 = pnand %p878_p8, %p872_p5 }
  0x17   :  { %882 = shalt.err (!%p879_p9)
}
  0x18   :  { %s913_s19 = smov 128   ;;  %s914_s20 = smov 8  }
  0x19   :  { %33 = dma.hbm_to_vmem [thread:$0]  %s1002_s1, 256, %s28_s17, [#allocation6], %s913_s19, %s913_s19, %s914_s20  }
  0x1a   :  { %903 = dma.done.wait [#allocation3], 512  }
  0x1b   :  { %904 = vsyncadd [#allocation3], 4294966784 }
  0x1c   :  { %905 = dma.done.wait [#allocation6], 256  }
  0x1d   :  { %906 = vsyncadd [#allocation6], 4294967040  ;;  %v915_v0 = vmov 0.0   ;;  %v916_v1 = vmov 8   ;;  %v945_v2 = vld [vmem:[#allocation2 + $0x8] sm:$0xff]  ;;  %v947_v3 = vld [vmem:[#allocation2] sm:$0xff] }
  0x1e   :  { %127 = vmatprep.mubr.f32.mxu0 %v915_v0  ;;  %833 = vset.pattern.permute.xlu0 %v916_v1  ;;  %v949_v4 = vld [vmem:[#allocation5] sm:$0xff]  ;;  %vm58_vm0 = vcmask 64512   ;;  %v41_v5 = vld [vmem:[#allocation5 + $0x8] sm:$0xf]  ;;  %vm264_vm1 = vcmask 1043456   ;;  %vm216_vm2 = vcmask 27648  }
  0x1f   :  { %93 = vmatprep.subr.mxu0 %v945_v2  ;;  %44 = vperm.xlu0 %833, %v949_v4   ;;  %v964_v28 = vld [vmem:[#allocation2 + $0x18] sm:$0xff]  ;;  %s917_s0 = smov 119   ;;  %vm260_vm3 = vcmask 31744   ;;  %v968_v30 = vld [vmem:[#allocation2 + $0x10] sm:$0xff]  ;;  %v918_v50 = vmov 13   ;;  %s919_s1 = smov [#allocation7]  }
  0x20   :  { %94 = vmatpush1.msra.mxu0 %v947_v3  ;;  %s793_s23 = sshll.u32 %s919_s1, 4  ;;  %s794_s23 = int_to_ptr.vmem [resolvable:$true] %s793_s23 }
  0x21   :  { %806 = vmatmul.mubr.msk.f32.vlgmr.msra.gmra.mxu0 %vm58_vm0, %v949_v4  ;;  %s883_s24 = scalar_lea.vmem %s794_s23, 512  ;;  %p888_p11 = scmp.lt.s32.totalorder %s794_s23, %s794_s23 }
  0x22   :  { %133 = vmatprep.mubr.f32.mxu0 %v915_v0  ;;  %p884_p10 = scmp.ne.s32.totalorder %s794_s23, %s883_s24  ;;  %p889_p12 = scmp.lt.s32.totalorder %s883_s24, %s883_s24 }
  0x23   :  { %49 = vperm.xlu0 %833, %v41_v5  }
  0x24   :  { %p890_p13 = por %p889_p12, %p888_p11 }
  0x25   :  { %807 = vmatmul.mubr.msk.f32.gmra.mxu0 %vm58_vm0, %v41_v5 }
  0x26   :  { %414 = vmatprep.mubr.f32.mxu0 %v915_v0  ;;  %p891_p0 = pnand %p890_p13, %p884_p10 }
  0x9a   :  { %v45_v6 = vpop.permute.xlu0 %44 }
  0x9e   :  { %v50_v13 = vpop.permute.xlu0 %49 }
  0xe1   :  { %v129_v7 = vpop.f32.mrf.mxu0 }
  0xe2   :  { %v130_v8 = vadd.f32 %v129_v7, %v45_v6 }
  0xe3   :  { %v131_v9 = vpop.f32.mrf.mxu0 }
  0xe4   :  { %v132_v10 = vadd.f32 %v131_v9, %v45_v6  ;;  %v142_v15 = vrot.slane %v130_v8, 4 }
  0xe5   :  { %v135_v11 = vpop.f32.mrf.mxu0 }
  0xe6   :  { %v143_v12 = vrot.slane %v132_v10, 4  ;;  %v136_v17 = vadd.f32 %v135_v11, %v50_v13 }
  0xe7   :  { %v137_v14 = vpop.f32.mrf.mxu0 }
  0xe8   :  { %176 = vmatprep.subr.mxu1 %v143_v12  ;;  %v138_v16 = vadd.f32 %v137_v14, %v50_v13 }
  0xe9   :  { %177 = vmatpush1.xpose.msra.mxu1 %v142_v15 }
  0xea   :  { %210 = vmatprep.mubr.f32.mxu1 %v138_v16  ;;  %808 = vmatprep.subr.msk.mxu1 %vm264_vm1, %v132_v10 }
  0xec   :  { %211 = vmatmul.mubr.f32.vlgmr.msra.gmra.mxu1 %v136_v17 }
  0xed   :  { %809 = vmatpush1.msk.msra.mxu1 %vm264_vm1, %v130_v8  ;;  %333 = vmatprep.mubr.f32.mxu1 %v915_v0 }
  0xee   :  { %460 = vmatprep.subr.mxu1 %v964_v28 }
 0x1ac   :  { %v212_v18 = vpop.f32.mrf.mxu1 }
 0x1ad   :  { %v217_v19 = vsel %vm216_vm2, %v212_v18, -inf }
 0x1ae   :  { %218 = vmax.xlane.f32.xlu1 %v217_v19  ;;  %v214_v20 = vpop.f32.mrf.mxu1 }
 0x237   :  { %v219_v21 = vpop.xlane.xlu1 %218 }
 0x238   :  { %v220_v22 = vsub.f32 %v212_v18, %v219_v21 }
 0x23a   :  { %v221_v23 = vmul.f32 1.442695, %v220_v22 }
 0x23c   :  { %835 = vpow2.f32 %v221_v23 }
 0x249   :  { %v836_v24 = vpop.eup %835 }
 0x24a   :  { %v223_v25 = vsel %vm216_vm2, %v836_v24, 0.0 }
 0x24b   :  { %224 = vadd.xlane.f32.xlu1 %v223_v25 }
 0x25c   :  { %340 = vrot.lane.b32.xlu1 %v949_v4, %s917_s0 }
 0x2d4   :  { %v225_v26 = vpop.xlane.xlu1 %224 }
 0x2d5   :  { %837 = vrcp.f32 %v225_v26 }
 0x2d8   :  { %v341_v34 = vpop.permute.xlu1 %340 }
 0x2e2   :  { %v838_v27 = vpop.eup %837 }
 0x2e3   :  { %v227_v29 = vmul.f32 %v838_v27, %v836_v24 }
 0x2e5   :  { %228 = vxpose.xlu0.b32.start.end [1/1] (short) (narrow) %v227_v29, 8 }
 0x30e   :  { %834 = vset.pattern.permute.xlu0 %v918_v50 }
 0x361   :  { %v244_v31 = vpop.trf.xlu0 }
 0x362   :  { %810 = vmatmul.mubr.msk.f32.vlgmr.msra.gmra.mxu1 %vm260_vm3, %v244_v31 }
 0x363   :  { %461 = vmatpush1.msra.mxu1 %v968_v30  ;;  %494 = vmatprep.mubr.f32.mxu1 %v915_v0 }
 0x366   :  { %814 = vmatmul.mubr.msk.f32.vlgmr.msra.gmra.mxu1 %vm58_vm0, %v949_v4 }
 0x367   :  { %500 = vmatprep.mubr.f32.mxu1 %v915_v0 }
 0x36a   :  { %815 = vmatmul.mubr.msk.f32.gmra.mxu1 %vm58_vm0, %v41_v5 }
 0x36b   :  { %774 = vmatprep.mubr.f32.mxu1 %v915_v0 }
 0x422   :  { %v335_v32 = vpop.f32.mrf.mxu1 }
 0x424   :  { %v337_v33 = vpop.f32.mrf.mxu1 }
 0x425   :  { %811 = vmatprep.subr.msk.mxu0 %vm264_vm1, %v337_v33 }
 0x426   :  { %812 = vmatpush1.msk.msra.mxu0 %vm264_vm1, %v335_v32  ;;  %v496_v35 = vpop.f32.mrf.mxu1 }
 0x427   :  { %813 = vmatmul.mubr.msk.f32.vlgmr.msra.gmra.mxu0 %vm260_vm3, %v341_v34  ;;  %v497_v36 = vadd.f32 %v496_v35, %v45_v6 }
 0x428   :  { %v498_v37 = vpop.f32.mrf.mxu1 }
 0x429   :  { %v499_v38 = vadd.f32 %v498_v37, %v45_v6  ;;  %v509_v41 = vrot.slane %v497_v36, 4 }
 0x42a   :  { %v502_v39 = vpop.f32.mrf.mxu1 }
 0x42b   :  { %v510_v40 = vrot.slane %v499_v38, 4  ;;  %v503_v44 = vadd.f32 %v502_v39, %v50_v13 }
 0x42c   :  { %v504_v42 = vpop.f32.mrf.mxu1 }
 0x42d   :  { %v505_v43 = vadd.f32 %v504_v42, %v50_v13  ;;  %543 = vmatprep.subr.mxu0 %v510_v40 }
 0x42e   :  { %544 = vmatpush1.xpose.msra.mxu0 %v509_v41 }
 0x42f   :  { %577 = vmatprep.mubr.f32.mxu0 %v505_v43  ;;  %816 = vmatprep.subr.msk.mxu0 %vm264_vm1, %v499_v38 }
 0x431   :  { %578 = vmatmul.mubr.f32.vlgmr.msra.gmra.mxu0 %v503_v44 }
 0x432   :  { %817 = vmatpush1.msk.msra.mxu0 %vm264_vm1, %v497_v36  ;;  %697 = vmatprep.mubr.f32.mxu0 %v915_v0 }
 0x4e7   :  { %v416_v45 = vpop.f32.mrf.mxu0 }
 0x4e9   :  { %v418_v46 = vpop.f32.mrf.mxu0 }
 0x4f1   :  { %v579_v47 = vpop.f32.mrf.mxu0 }
 0x4f2   :  { %v583_v48 = vsel %vm216_vm2, %v579_v47, -inf }
 0x4f3   :  { %584 = vmax.xlane.f32.xlu1 %v583_v48  ;;  %v581_v49 = vpop.f32.mrf.mxu0 }
 0x57c   :  { %v585_v51 = vpop.xlane.xlu1 %584 }
 0x57d   :  { %v586_v52 = vsub.f32 %v579_v47, %v585_v51 }
 0x57f   :  { %v587_v53 = vmul.f32 1.442695, %v586_v52 }
 0x581   :  { %839 = vpow2.f32 %v587_v53 }
 0x58e   :  { %v840_v54 = vpop.eup %839 }
 0x58f   :  { %v589_v55 = vsel %vm216_vm2, %v840_v54, 0.0 }
 0x590   :  { %590 = vadd.xlane.f32.xlu0 %v589_v55 }
 0x5a6   :  { %53 = vperm.xlu0 %834, %v949_v4  }
 0x619   :  { %v591_v56 = vpop.xlane.xlu0 %590 }
 0x61a   :  { %841 = vrcp.f32 %v591_v56 }
 0x621   :  { %v54_v57 = vpop.permute.xlu0 %53 }
 0x622   :  { %v417_v58 = vadd.f32 %v416_v45, %v54_v57  ;;  %v419_v59 = vadd.f32 %v418_v46, %v54_v57 }
 0x624   :  { %v421_v60 = vadd.f32 %v417_v58, %v947_v3  ;;  %v422_v61 = vadd.f32 %v419_v59, %v945_v2 }
 0x626   :  { %v423_v62 = vmax.f32 %v421_v60, 0.0  ;;  %v424_v63 = vmax.f32 %v422_v61, 0.0 }
 0x627   :  { %v842_v0 = vpop.eup %841 }
 0x628   :  { %425 = vst [vmem:[#allocation7] sm:$0xff] %v423_v62  ;;  %426 = vst [vmem:[#allocation7 + $0x8] sm:$0xff] %v424_v63  ;;  %v593_v1 = vmul.f32 %v842_v0, %v840_v54 }
 0x62a   :  { %594 = vxpose.xlu1.b32.start.end [1/1] (short) (narrow) %v593_v1, 8 }
 0x6a6   :  { %v610_v5 = vpop.trf.xlu1 }
 0x6a7   :  { %818 = vmatmul.mubr.msk.f32.vlgmr.msra.gmra.mxu0 %vm260_vm3, %v610_v5 }
 0x767   :  { %v699_v4 = vpop.f32.mrf.mxu0 }
 0x769   :  { %v701_v6 = vpop.f32.mrf.mxu0 }
 0x76a   :  { %819 = vmatprep.subr.msk.mxu1 %vm264_vm1, %v701_v6 }
 0x76b   :  { %820 = vmatpush1.msk.msra.mxu1 %vm264_vm1, %v699_v4 }
 0x76c   :  { %821 = vmatmul.mubr.msk.f32.vlgmr.msra.gmra.mxu1 %vm260_vm3, %v341_v34 }
 0x82c   :  { %v776_v3 = vpop.f32.mrf.mxu1 }
 0x82d   :  { %v777_v2 = vadd.f32 %v776_v3, %v54_v57 }
 0x82e   :  { %v778_v7 = vpop.f32.mrf.mxu1 }
 0x82f   :  { %v781_v8 = vadd.f32 %v777_v2, %v968_v30  ;;  %v779_v9 = vadd.f32 %v778_v7, %v54_v57 }
 0x831   :  { %v783_v10 = vmax.f32 %v781_v8, 0.0  ;;  %v782_v11 = vadd.f32 %v779_v9, %v964_v28 }
 0x833   :  { %786 = vst [vmem:[#allocation7 + $0x10] sm:$0xff] %v783_v10  ;;  %v784_v12 = vmax.f32 %v782_v11, 0.0 }
 0x835   :  { %787 = vst [vmem:[#allocation7 + $0x18] sm:$0xff] %v784_v12 }
 0x836   :  { %894 = shalt.err (!%p891_p0)
}
 0x837   :  { %799 = dma.vmem_to_hbm [thread:$0]  %s794_s23, 512, %s1003_s2, [#allocation4], %s910_s12, %s910_s12, %s911_s13  }
 0x838   :  { %907 = dma.done.wait [#allocation4], 512  }
 0x839   :  { %908 = vsyncadd [#allocation4], 4294966784 }
 0x83a   :  { %803 = vsyncpa [#allocation3], 1 }
 0x83b   :  { %804 = vsyncpa [#allocation6], 1 }
 0x83c   :  { %805 = vsyncpa [#allocation4], 1 }

</bundles_post_ra>
